<compile_context>
chip_gen: v6e
topology: v6e:2x2x1
jax: 0.10.0
libtpu: 0.0.40
codegen_flags: <defaults>
</compile_context>

<pallas_src>
import numpy as np
import jax
import jax.numpy as jnp
from jax.experimental import pallas as pl
from jax.experimental.pallas import tpu as pltpu


def _round_up(n, m):
    return ((n + m - 1) // m) * m


def _cdiv(a, b):
    return (a + b - 1) // b


def _make_kernel(n_mats, rest_biases, relu_flags, mm_dtype, hidden_dtype):
    """Fused-MLP kernel.  Refs: x, b01, w_0..w_{n_mats-1}, out.

    Layer 0 here is the pre-composed (layer0 @ layer1) matmul with a vector
    bias; the remaining layers use scalar biases baked in as immediates.
    Padded weight columns are zero, so stray bias values on padded lanes feed
    zero rows of the next layer and never reach the sliced output.
    """
    assert len(relu_flags) == n_mats and len(rest_biases) == n_mats - 1

    def kernel(*refs):
        x_ref, b01_ref = refs[0], refs[1]
        w_refs = refs[2:2 + n_mats]
        o_ref = refs[2 + n_mats]

        # Fused first layer: f32 accumulation on the MXU, one cast afterwards.
        h = jnp.dot(x_ref[...].astype(mm_dtype), w_refs[0][...],
                    preferred_element_type=jnp.float32)
        h = h.astype(hidden_dtype) + b01_ref[...].astype(hidden_dtype)
        if relu_flags[0]:
            h = jnp.maximum(h, 0.0)

        for w_ref, b, use_relu in zip(w_refs[1:], rest_biases, relu_flags[1:]):
            h = jnp.dot(h.astype(mm_dtype), w_ref[...],
                        preferred_element_type=jnp.float32)
            h = h.astype(hidden_dtype) + b            # scalar bias: immediate
            if use_relu:
                h = jnp.maximum(h, 0.0)

        o_ref[...] = h.astype(o_ref.dtype)

    return kernel


def pydjinn_forward(x, weights, biases, *, batch_tile=1024, min_grid_steps=1,
                    mm_dtype=jnp.float32, hidden_dtype=None, out_dtype=None):
    """PyDJINN forward.

    weights : list of (out_features, in_features) arrays (PyTorch Linear).
    biases  : list of per-layer scalar bias fills; the LAST entry corresponds
              to biases['out'] in the PyTorch module.
    batch_tile     : upper bound on the per-grid-step batch tile.
    min_grid_steps : 2 on v7x (2 TensorCores/chip), 1 on v5e/v6e.
    mm_dtype       : matmul operand dtype (bf16 is fast on v5e/v6e/v7x MXUs).
    hidden_dtype   : inter-layer activation / elementwise dtype.  Defaults to
                     mm_dtype; on v5e pass jnp.float32 when using bf16 operands
                     (v5e's VPU has no bf16 elementwise path).
    """
    L = len(weights)
    assert L >= 2
    assert len(biases) == len(weights), "need one bias per layer (last = 'out')"
    if hidden_dtype is None:
        hidden_dtype = mm_dtype
    if out_dtype is None:
        out_dtype = jnp.float32

    B, D_in = x.shape
    out_dim = int(weights[-1].shape[0])

    W = [jnp.asarray(w, jnp.float32) for w in weights]
    dims = [int(D_in)] + [int(w.shape[0]) for w in W]

    # ---- Algebraic fusion of layers 0 and 1 (no activation between them) ----
    #   (x @ W0.T + b0) @ W1.T + b1 == x @ (W0.T @ W1.T) + (b0*rowsum(W1) + b1)
    wt_fused = W[0].T @ W[1].T                                      # (D_in, h1)
    b01 = float(biases[0]) * jnp.sum(W[1], axis=1) + float(biases[1])
    mats = [wt_fused] + [W[i].T for i in range(2, L)]               # (in, out)
    fdims = [int(D_in)] + dims[2:]                                  # fused widths
    # Only *output* dims are lane-padded; K of the first matmul stays D_in.
    pdims = [int(D_in)] + [_round_up(d, 128) for d in fdims[1:]]

    wts = []
    for i, m in enumerate(mats):
        m = jnp.pad(m, ((0, pdims[i] - m.shape[0]),
                        (0, pdims[i + 1] - m.shape[1])))
        wts.append(m.astype(mm_dtype))
    b01p = jnp.pad(b01, (0, pdims[1] - fdims[1])).reshape(1, pdims[1])
    b01p = b01p.astype(jnp.float32)

    n_mats = len(mats)                                              # == L - 1
    relu_flags = [False] if L == 2 else [True] * (L - 2) + [False]
    rest_biases = [float(b) for b in biases[2:]]

    # ---- Batch tiling: fewest grid steps respecting batch_tile and the ----
    # ---- requested parallel-step count (v7x megacore).                  ----
    SUB = 16                                   # 16 sublanes: bf16-pack safe
    steps = max(int(min_grid_steps), _cdiv(B, max(int(batch_tile), SUB)))
    bt = _round_up(max(_cdiv(B, steps), SUB), SUB)
    Bp = _round_up(B, bt)
    xp = jnp.pad(jnp.asarray(x, jnp.float32), ((0, Bp - B), (0, 0)))

    kernel = _make_kernel(n_mats, rest_biases, relu_flags, mm_dtype,
                          hidden_dtype)

    grid = (Bp // bt,)
    in_specs = [
        pl.BlockSpec((bt, D_in), lambda i: (i, 0)),        # x, unpadded K
        pl.BlockSpec((1, pdims[1]), lambda i: (0, 0)),     # fused bias vector
    ]
    for wt in wts:
        # Whole (padded) weight resident in VMEM, constant block index.
        in_specs.append(pl.BlockSpec(wt.shape, lambda i: (0, 0)))
    out_specs = pl.BlockSpec((bt, pdims[-1]), lambda i: (i, 0))    # lane-dense

    # ---- Resource hints ----------------------------------------------------
    mm_bytes = np.dtype(mm_dtype).itemsize
    out_bytes = np.dtype(out_dtype).itemsize
    weight_bytes = sum(w.size * mm_bytes for w in wts) + b01p.size * 4
    flops = 2 * Bp * sum(pdims[i] * pdims[i + 1] for i in range(n_mats))
    bytes_accessed = (xp.size * 4 + Bp * pdims[-1] * out_bytes + weight_bytes)
    # VMEM: double-buffered x/out streams + (double-buffered) resident weights
    # + a few activation-sized temporaries, with margin, capped at v7x's
    # 64 MiB physical VMEM per TensorCore.
    vmem_est = (2 * (bt * D_in * 4 + bt * pdims[-1] * out_bytes)
                + 2 * weight_bytes
                + 4 * bt * max(pdims) * 4)
    vmem_limit = int(min(max(4 * vmem_est, 16 << 20), 64 << 20))

    yp = pl.pallas_call(
        kernel,
        out_shape=jax.ShapeDtypeStruct((Bp, pdims[-1]), out_dtype),
        grid=grid,
        in_specs=in_specs,
        out_specs=out_specs,
        compiler_params=pltpu.CompilerParams(
            dimension_semantics=("parallel",),
            vmem_limit_bytes=vmem_limit),
        cost_estimate=pl.CostEstimate(flops=flops, transcendentals=0,
                                      bytes_accessed=bytes_accessed),
    )(xp, b01p, *wts)

    return yp[:B, :out_dim]


def pydjinn_reference(x, weights, biases):
    """Pure-JAX reference mirroring the PyTorch module exactly."""
    h = x @ jnp.asarray(weights[0], jnp.float32).T + jnp.float32(biases[0])
    for i in range(1, len(weights) - 1):
        h = h @ jnp.asarray(weights[i], jnp.float32).T + jnp.float32(biases[i])
        h = jnp.maximum(h, 0.0)
    return h @ jnp.asarray(weights[-1], jnp.float32).T + jnp.float32(biases[-1])


if __name__ == "__main__":
    key = jax.random.PRNGKey(0)

    # DJINN-style net: 32 -> 64 -> 64 -> 64 -> 16, batch 256.
    batch, input_dim = 256, 32
    hidden0, hidden1, hidden2, out_dim = 64, 64, 64, 16

    k_x, k0, k1, k2, k3 = jax.random.split(key, 5)
    x = jax.random.normal(k_x, (batch, input_dim), dtype=jnp.float32)

    # weights[i] has PyTorch Linear shape (out_features, in_features)
    weights = [
        jax.random.normal(k0, (hidden0, input_dim), dtype=jnp.float32) * 0.1,
        jax.random.normal(k1, (hidden1, hidden0), dtype=jnp.float32) * 0.1,
        jax.random.normal(k2, (hidden2, hidden1), dtype=jnp.float32) * 0.1,
        jax.random.normal(k3, (out_dim, hidden2), dtype=jnp.float32) * 0.1,
    ]
    # biases[i] are scalar fills in the PyTorch module; the last is biases['out'].
    biases = [0.1, 0.2, 0.3, 0.05]

    y_ref = pydjinn_reference(x, weights, biases)

    # f32 operands, single grid step (v5e / v6e small-batch style).
    y = jax.block_until_ready(pydjinn_forward(x, weights, biases))
    assert y.shape == (batch, out_dim)
    assert jnp.allclose(y, y_ref, atol=1e-3, rtol=1e-3), "f32 mismatch vs reference"

    # bf16 operands + bf16 intermediates, two balanced parallel tiles (v7x style).
    y_bf16 = jax.block_until_ready(
        pydjinn_forward(x, weights, biases, mm_dtype=jnp.bfloat16,
                        min_grid_steps=2))
    assert y_bf16.shape == (batch, out_dim)
    assert jnp.allclose(y_bf16, y_ref, atol=1e-1, rtol=1e-1), "bf16 mismatch vs reference"

    print("KERNEL_OK")
</pallas_src>

<mosaic_0001>
module attributes {stable_mosaic.version = 11 : i64} {
  func.func @kernel(%arg0: i32, %arg1: memref<256x32xf32, #tpu.memory_space<vmem>>, %arg2: memref<1x128xf32, #tpu.memory_space<vmem>>, %arg3: memref<32x128xf32, #tpu.memory_space<vmem>>, %arg4: memref<128x128xf32, #tpu.memory_space<vmem>>, %arg5: memref<128x128xf32, #tpu.memory_space<vmem>>, %arg6: memref<256x128xf32, #tpu.memory_space<vmem>>) attributes {dimension_semantics = [#tpu.dimension_semantics<parallel>], iteration_bounds = array<i64: 1>, scalar_prefetch = 0 : i64, scratch_operands = 0 : i64, tpu.core_type = #tpu.core_type<tc>, window_params = [{transform_indices = @transform_0, window_bounds = array<i64: 256, 32>}, {pipeline_mode = #tpu.pipeline_mode<synchronous>, transform_indices = @transform_1, window_bounds = array<i64: 1, 128>}, {pipeline_mode = #tpu.pipeline_mode<synchronous>, transform_indices = @transform_2, window_bounds = array<i64: 32, 128>}, {pipeline_mode = #tpu.pipeline_mode<synchronous>, transform_indices = @transform_3, window_bounds = array<i64: 128, 128>}, {pipeline_mode = #tpu.pipeline_mode<synchronous>, transform_indices = @transform_4, window_bounds = array<i64: 128, 128>}, {transform_indices = @transform_5, window_bounds = array<i64: 256, 128>}]} {
    %c0 = arith.constant 0 : index
    %c0_0 = arith.constant 0 : index
    %0 = vector.load %arg1[%c0, %c0_0] : memref<256x32xf32, #tpu.memory_space<vmem>>, vector<256x32xf32>
    %c0_1 = arith.constant 0 : index
    %c0_2 = arith.constant 0 : index
    %1 = vector.load %arg3[%c0_1, %c0_2] : memref<32x128xf32, #tpu.memory_space<vmem>>, vector<32x128xf32>
    %cst = arith.constant dense<0.000000e+00> : vector<256x128xf32>
    %2 = tpu.matmul %0, %1, %cst {dimension_numbers = #tpu.dot_dimension_numbers<[1], [0], [0], [1], [0, 0, 1, 1], [], []>} : vector<256x32xf32>, vector<32x128xf32>, vector<256x128xf32> -> vector<256x128xf32>
    %c0_3 = arith.constant 0 : index
    %c0_4 = arith.constant 0 : index
    %3 = vector.load %arg2[%c0_3, %c0_4] : memref<1x128xf32, #tpu.memory_space<vmem>>, vector<1x128xf32>
    %4 = vector.broadcast %3 : vector<1x128xf32> to vector<256x128xf32>
    %5 = arith.addf %2, %4 : vector<256x128xf32>
    %cst_5 = arith.constant 0.000000e+00 : f32
    %6 = vector.broadcast %cst_5 : f32 to vector<256x128xf32>
    %7 = arith.maximumf %5, %6 : vector<256x128xf32>
    %c0_6 = arith.constant 0 : index
    %c0_7 = arith.constant 0 : index
    %8 = vector.load %arg4[%c0_6, %c0_7] : memref<128x128xf32, #tpu.memory_space<vmem>>, vector<128x128xf32>
    %cst_8 = arith.constant dense<0.000000e+00> : vector<256x128xf32>
    %9 = tpu.matmul %7, %8, %cst_8 {dimension_numbers = #tpu.dot_dimension_numbers<[1], [0], [0], [1], [0, 0, 1, 1], [], []>} : vector<256x128xf32>, vector<128x128xf32>, vector<256x128xf32> -> vector<256x128xf32>
    %cst_9 = arith.constant 3.000000e-01 : f32
    %10 = vector.broadcast %cst_9 : f32 to vector<256x128xf32>
    %11 = arith.addf %9, %10 : vector<256x128xf32>
    %cst_10 = arith.constant 0.000000e+00 : f32
    %12 = vector.broadcast %cst_10 : f32 to vector<256x128xf32>
    %13 = arith.maximumf %11, %12 : vector<256x128xf32>
    %c0_11 = arith.constant 0 : index
    %c0_12 = arith.constant 0 : index
    %14 = vector.load %arg5[%c0_11, %c0_12] : memref<128x128xf32, #tpu.memory_space<vmem>>, vector<128x128xf32>
    %cst_13 = arith.constant dense<0.000000e+00> : vector<256x128xf32>
    %15 = tpu.matmul %13, %14, %cst_13 {dimension_numbers = #tpu.dot_dimension_numbers<[1], [0], [0], [1], [0, 0, 1, 1], [], []>} : vector<256x128xf32>, vector<128x128xf32>, vector<256x128xf32> -> vector<256x128xf32>
    %cst_14 = arith.constant 5.000000e-02 : f32
    %16 = vector.broadcast %cst_14 : f32 to vector<256x128xf32>
    %17 = arith.addf %15, %16 : vector<256x128xf32>
    %c0_15 = arith.constant 0 : index
    %c0_16 = arith.constant 0 : index
    %18 = vector.load %arg6[%c0_15, %c0_16] : memref<256x128xf32, #tpu.memory_space<vmem>>, vector<256x128xf32>
    tpu.vector_store %arg6[%c0_15, %c0_16], %17 {strides = array<i32>} : memref<256x128xf32, #tpu.memory_space<vmem>>, vector<256x128xf32>,
    return
  }
  func.func @transform_0(%arg0: i32) -> (i32, i32) {
    %c0_i32 = arith.constant 0 : i32
    %c0_i32_0 = arith.constant 0 : i32
    return %arg0, %c0_i32 : i32, i32
  }
  func.func @transform_1(%arg0: i32) -> (i32, i32) {
    %c0_i32 = arith.constant 0 : i32
    %c0_i32_0 = arith.constant 0 : i32
    %c0_i32_1 = arith.constant 0 : i32
    return %c0_i32, %c0_i32_0 : i32, i32
  }
  func.func @transform_2(%arg0: i32) -> (i32, i32) {
    %c0_i32 = arith.constant 0 : i32
    %c0_i32_0 = arith.constant 0 : i32
    %c0_i32_1 = arith.constant 0 : i32
    return %c0_i32, %c0_i32_0 : i32, i32
  }
  func.func @transform_3(%arg0: i32) -> (i32, i32) {
    %c0_i32 = arith.constant 0 : i32
    %c0_i32_0 = arith.constant 0 : i32
    %c0_i32_1 = arith.constant 0 : i32
    return %c0_i32, %c0_i32_0 : i32, i32
  }
  func.func @transform_4(%arg0: i32) -> (i32, i32) {
    %c0_i32 = arith.constant 0 : i32
    %c0_i32_0 = arith.constant 0 : i32
    %c0_i32_1 = arith.constant 0 : i32
    return %c0_i32, %c0_i32_0 : i32, i32
  }
  func.func @transform_5(%arg0: i32) -> (i32, i32) {
    %c0_i32 = arith.constant 0 : i32
    %c0_i32_0 = arith.constant 0 : i32
    return %arg0, %c0_i32 : i32, i32
  }
}

</mosaic_0001>

<bundles_post_ra>
// kernel: tpu_custom_call.1
= control target key start
LH: loop header
LB: loop body
LE: loop exit
PB: predicated region body
PF: predicated region fallthrough
CT: control target
= control target key end

     0   :  { %vm64_vm0 = vcmask 261120   ;;  %s1712_s0 = inlined_call_operand.vmem [shape: f32[256,32], index: 0, kind: input, shape index: {}]   ;;  %s1713_s1 = inlined_call_operand.vmem [shape: f32[1,128], index: 1, kind: input, shape index: {}]   ;;  %s1714_s2 = inlined_call_operand.vmem [shape: f32[32,128], index: 2, kind: input, shape index: {}]   ;;  %s1715_s3 = inlined_call_operand.vmem [shape: f32[128,128], index: 3, kind: input, shape index: {}]   ;;  %s1716_s4 = inlined_call_operand.vmem [shape: f32[128,128], index: 4, kind: input, shape index: {}]   ;;  %s1717_s5 = inlined_call_operand.hbm [shape: f32[256,128], index: 5, kind: output, shape index: {}]  }
   0x1   :  { %v56_v0 = vld [vmem:[%s1714_s2 + $0x18] sm:$0xff]  ;;  %v55_v1 = vld [vmem:[%s1714_s2 + $0x10] sm:$0xff]  ;;  %v21_v2 = vld [vmem:[%s1712_s0] sm:$0xff] }
   0x2   :  { %1145 = vmatprep.subr.mxu0 %v56_v0  ;;  %1361 = vmatprep.subr.mxu1 %v56_v0  ;;  %v54_v3 = vld [vmem:[%s1714_s2 + $0x8] sm:$0xff]  ;;  %v53_v4 = vld [vmem:[%s1714_s2] sm:$0xff]  ;;  %v23_v6 = vld [vmem:[%s1712_s0 + $0x10] sm:$0xff] }
   0x3   :  { %1146 = vmatpush3.msra.mxu0 %v56_v0  ;;  %1153 = vmatprep.mubr.msk.f32.mxu0 %vm64_vm0, %v21_v2  ;;  %v22_v5 = vld [vmem:[%s1712_s0 + $0x8] sm:$0xff]  ;;  %v37_v7 = vld [vmem:[%s1712_s0 + $0x80] sm:$0xff]  ;;  %v39_v9 = vld [vmem:[%s1712_s0 + $0x90] sm:$0xff] }
   0x4   :  { %1147 = vmatprep.subr.mxu0 %v55_v1  ;;  %1365 = vmatpush3.msra.mxu1 %v56_v0  ;;  %v38_v8 = vld [vmem:[%s1712_s0 + $0x88] sm:$0xff]  ;;  %v24_v10 = vld [vmem:[%s1712_s0 + $0x18] sm:$0xff]  ;;  %v25_v11 = vld [vmem:[%s1712_s0 + $0x20] sm:$0xff] }
   0x5   :  { %1148 = vmatpush3.msra.mxu0 %v55_v1  ;;  %1362 = vmatprep.subr.mxu1 %v55_v1  ;;  %v40_v12 = vld [vmem:[%s1712_s0 + $0x98] sm:$0xff]  ;;  %v432_v14 = vld [vmem:[%s1715_s3 + $0x70] sm:$0xff]  ;;  %v41_v15 = vld [vmem:[%s1712_s0 + $0xa0] sm:$0xff] }
   0x6   :  { %1149 = vmatprep.subr.mxu0 %v54_v3  ;;  %1366 = vmatpush3.msra.mxu1 %v55_v1  ;;  %v433_v13 = vld [vmem:[%s1715_s3 + $0x78] sm:$0xff]  ;;  %v26_v16 = vld [vmem:[%s1712_s0 + $0x28] sm:$0xff]  ;;  %v27_v18 = vld [vmem:[%s1712_s0 + $0x30] sm:$0xff] }
   0x7   :  { %1150 = vmatpush3.msra.mxu0 %v54_v3  ;;  %1363 = vmatprep.subr.mxu1 %v54_v3  ;;  %v431_v17 = vld [vmem:[%s1715_s3 + $0x68] sm:$0xff]  ;;  %v430_v20 = vld [vmem:[%s1715_s3 + $0x60] sm:$0xff] }
   0x8   :  { %1151 = vmatprep.subr.mxu0 %v53_v4  ;;  %1367 = vmatpush3.msra.mxu1 %v54_v3  ;;  %v42_v19 = vld [vmem:[%s1712_s0 + $0xa8] sm:$0xff] }
   0x9   :  { %1152 = vmatpush3.msra.mxu0 %v53_v4  ;;  %1364 = vmatprep.subr.mxu1 %v53_v4 }
   0xa   :  { %1154 = vmatmul.mubr.msk.f32.vlgmr.msra.gmra.mxu0 %vm64_vm0, %v22_v5  ;;  %1368 = vmatpush3.msra.mxu1 %v53_v4 }
   0xb   :  { %1156 = vmatprep.mubr.msk.f32.mxu0 %vm64_vm0, %v23_v6  ;;  %1177 = vmatprep.mubr.msk.f32.mxu1 %vm64_vm0, %v37_v7 }
   0xc   :  { %1178 = vmatmul.mubr.msk.f32.vlgmr.msra.gmra.mxu1 %vm64_vm0, %v38_v8  ;;  %1201 = vmatprep.subr.mxu1 %v433_v13 }
   0xd   :  { %1180 = vmatprep.mubr.msk.f32.mxu1 %vm64_vm0, %v39_v9  ;;  %1202 = vmatpush3.msra.mxu1 %v433_v13 }
   0xe   :  { %1157 = vmatmul.mubr.msk.f32.gmra.mxu0 %vm64_vm0, %v24_v10  ;;  %1203 = vmatprep.subr.mxu1 %v432_v14 }
   0xf   :  { %1159 = vmatprep.mubr.msk.f32.mxu0 %vm64_vm0, %v25_v11  ;;  %1204 = vmatpush3.msra.mxu1 %v432_v14 }
  0x10   :  { %1181 = vmatmul.mubr.msk.f32.gmra.mxu1 %vm64_vm0, %v40_v12 }
  0x11   :  { %1183 = vmatprep.mubr.msk.f32.mxu1 %vm64_vm0, %v41_v15 }
  0x12   :  { %10 = vsyncpa [#allocation3], 0  ;;  %1160 = vmatmul.mubr.msk.f32.gmra.mxu0 %vm64_vm0, %v26_v16  ;;  %v43_v21 = vld [vmem:[%s1712_s0 + $0xb0] sm:$0xff]  ;;  %1205 = vmatprep.subr.mxu1 %v431_v17  ;;  %v28_v22 = vld [vmem:[%s1712_s0 + $0x38] sm:$0xff] }
  0x13   :  { %1162 = vmatprep.mubr.msk.f32.mxu0 %vm64_vm0, %v27_v18  ;;  %1206 = vmatpush3.msra.mxu1 %v431_v17  ;;  %v429_v23 = vld [vmem:[%s1715_s3 + $0x58] sm:$0xff]  ;;  %v29_v24 = vld [vmem:[%s1712_s0 + $0x40] sm:$0xff]  ;;  %v428_v26 = vld [vmem:[%s1715_s3 + $0x50] sm:$0xff] }
  0x14   :  { %1184 = vmatmul.mubr.msk.f32.gmra.mxu1 %vm64_vm0, %v42_v19  ;;  %1207 = vmatprep.subr.mxu1 %v430_v20  ;;  %v44_v25 = vld [vmem:[%s1712_s0 + $0xb8] sm:$0xff]  ;;  %v45_v27 = vld [vmem:[%s1712_s0 + $0xc0] sm:$0xff]  ;;  %v30_v28 = vld [vmem:[%s1712_s0 + $0x48] sm:$0xff] }
  0x15   :  { %1186 = vmatprep.mubr.msk.f32.mxu1 %vm64_vm0, %v43_v21  ;;  %1208 = vmatpush3.msra.mxu1 %v430_v20  ;;  %v427_v29 = vld [vmem:[%s1715_s3 + $0x48] sm:$0xff]  ;;  %v31_v30 = vld [vmem:[%s1712_s0 + $0x50] sm:$0xff]  ;;  %v426_v32 = vld [vmem:[%s1715_s3 + $0x40] sm:$0xff] }
  0x16   :  { %1163 = vmatmul.mubr.msk.f32.gmra.mxu0 %vm64_vm0, %v28_v22  ;;  %1209 = vmatprep.subr.mxu1 %v429_v23  ;;  %v46_v31 = vld [vmem:[%s1712_s0 + $0xc8] sm:$0xff]  ;;  %v47_v33 = vld [vmem:[%s1712_s0 + $0xd0] sm:$0xff]  ;;  %v32_v34 = vld [vmem:[%s1712_s0 + $0x58] sm:$0xff] }
  0x17   :  { %1165 = vmatprep.mubr.msk.f32.mxu0 %vm64_vm0, %v29_v24  ;;  %1210 = vmatpush3.msra.mxu1 %v429_v23  ;;  %v425_v35 = vld [vmem:[%s1715_s3 + $0x38] sm:$0xff]  ;;  %v33_v36 = vld [vmem:[%s1712_s0 + $0x60] sm:$0xff]  ;;  %v424_v38 = vld [vmem:[%s1715_s3 + $0x30] sm:$0xff] }
  0x18   :  { %1187 = vmatmul.mubr.msk.f32.gmra.mxu1 %vm64_vm0, %v44_v25  ;;  %1211 = vmatprep.subr.mxu1 %v428_v26  ;;  %v48_v37 = vld [vmem:[%s1712_s0 + $0xd8] sm:$0xff]  ;;  %v49_v39 = vld [vmem:[%s1712_s0 + $0xe0] sm:$0xff]  ;;  %v34_v40 = vld [vmem:[%s1712_s0 + $0x68] sm:$0xff] }
  0x19   :  { %1189 = vmatprep.mubr.msk.f32.mxu1 %vm64_vm0, %v45_v27  ;;  %1212 = vmatpush3.msra.mxu1 %v428_v26  ;;  %v423_v41 = vld [vmem:[%s1715_s3 + $0x28] sm:$0xff]  ;;  %v35_v42 = vld [vmem:[%s1712_s0 + $0x70] sm:$0xff]  ;;  %v422_v44 = vld [vmem:[%s1715_s3 + $0x20] sm:$0xff] }
  0x1a   :  { %1166 = vmatmul.mubr.msk.f32.gmra.mxu0 %vm64_vm0, %v30_v28  ;;  %1213 = vmatprep.subr.mxu1 %v427_v29  ;;  %v50_v43 = vld [vmem:[%s1712_s0 + $0xe8] sm:$0xff]  ;;  %v51_v45 = vld [vmem:[%s1712_s0 + $0xf0] sm:$0xff]  ;;  %v36_v46 = vld [vmem:[%s1712_s0 + $0x78] sm:$0xff] }
  0x1b   :  { %1168 = vmatprep.mubr.msk.f32.mxu0 %vm64_vm0, %v31_v30  ;;  %1214 = vmatpush3.msra.mxu1 %v427_v29  ;;  %v421_v47 = vld [vmem:[%s1715_s3 + $0x18] sm:$0xff]  ;;  %v420_v49 = vld [vmem:[%s1715_s3 + $0x10] sm:$0xff]  ;;  %v419_v50 = vld [vmem:[%s1715_s3 + $0x8] sm:$0xff] }
  0x1c   :  { %1190 = vmatmul.mubr.msk.f32.gmra.mxu1 %vm64_vm0, %v46_v31  ;;  %1215 = vmatprep.subr.mxu1 %v426_v32  ;;  %v52_v48 = vld [vmem:[%s1712_s0 + $0xf8] sm:$0xff]  ;;  %v418_v51 = vld [vmem:[%s1715_s3] sm:$0xff]  ;;  %v705_v53 = vld [vmem:[%s1716_s4 + $0x70] sm:$0xff] }
  0x1d   :  { %1192 = vmatprep.mubr.msk.f32.mxu1 %vm64_vm0, %v47_v33  ;;  %1216 = vmatpush3.msra.mxu1 %v426_v32  ;;  %v706_v52 = vld [vmem:[%s1716_s4 + $0x78] sm:$0xff]  ;;  %v704_v54 = vld [vmem:[%s1716_s4 + $0x68] sm:$0xff]  ;;  %v703_v55 = vld [vmem:[%s1716_s4 + $0x60] sm:$0xff] }
  0x1e   :  { %1169 = vmatmul.mubr.msk.f32.gmra.mxu0 %vm64_vm0, %v32_v34  ;;  %1217 = vmatprep.subr.mxu1 %v425_v35  ;;  %v702_v56 = vld [vmem:[%s1716_s4 + $0x58] sm:$0xff]  ;;  %v701_v57 = vld [vmem:[%s1716_s4 + $0x50] sm:$0xff]  ;;  %v700_v58 = vld [vmem:[%s1716_s4 + $0x48] sm:$0xff] }
  0x1f   :  { %1171 = vmatprep.mubr.msk.f32.mxu0 %vm64_vm0, %v33_v36  ;;  %1218 = vmatpush3.msra.mxu1 %v425_v35  ;;  %v699_v59 = vld [vmem:[%s1716_s4 + $0x40] sm:$0xff]  ;;  %v698_v60 = vld [vmem:[%s1716_s4 + $0x38] sm:$0xff]  ;;  %v697_v61 = vld [vmem:[%s1716_s4 + $0x30] sm:$0xff] }
  0x20   :  { %1193 = vmatmul.mubr.msk.f32.gmra.mxu1 %vm64_vm0, %v48_v37  ;;  %1219 = vmatprep.subr.mxu1 %v424_v38  ;;  %v696_v62 = vld [vmem:[%s1716_s4 + $0x28] sm:$0xff]  ;;  %v695_v63 = vld [vmem:[%s1716_s4 + $0x20] sm:$0xff]  ;;  %v694_v0 = vld [vmem:[%s1716_s4 + $0x18] sm:$0xff] }
  0x21   :  { %1195 = vmatprep.mubr.msk.f32.mxu1 %vm64_vm0, %v49_v39  ;;  %1220 = vmatpush3.msra.mxu1 %v424_v38  ;;  %v1657_v1 = vld [vmem:[%s1713_s1] ss:$0 sm:$0xff] }
  0x22   :  { %1172 = vmatmul.mubr.msk.f32.gmra.mxu0 %vm64_vm0, %v34_v40  ;;  %1221 = vmatprep.subr.mxu1 %v423_v41 }
  0x23   :  { %1174 = vmatprep.mubr.msk.f32.mxu0 %vm64_vm0, %v35_v42  ;;  %1222 = vmatpush3.msra.mxu1 %v423_v41 }
  0x24   :  { %1196 = vmatmul.mubr.msk.f32.gmra.mxu1 %vm64_vm0, %v50_v43  ;;  %1223 = vmatprep.subr.mxu1 %v422_v44 }
  0x25   :  { %1198 = vmatprep.mubr.msk.f32.mxu1 %vm64_vm0, %v51_v45  ;;  %1224 = vmatpush3.msra.mxu1 %v422_v44 }
  0x26   :  { %1175 = vmatmul.mubr.msk.f32.gmra.mxu0 %vm64_vm0, %v36_v46  ;;  %1225 = vmatprep.subr.mxu1 %v421_v47 }
  0x27   :  { %1226 = vmatpush3.msra.mxu1 %v421_v47  ;;  %1281 = vmatprep.subr.mxu0 %v706_v52 }
  0x28   :  { %1199 = vmatmul.mubr.msk.f32.gmra.mxu1 %vm64_vm0, %v52_v48  ;;  %1227 = vmatprep.subr.mxu1 %v420_v49 }
  0x29   :  { %1228 = vmatpush3.msra.mxu1 %v420_v49  ;;  %1282 = vmatpush3.msra.mxu0 %v706_v52 }
  0x2a   :  { %1229 = vmatprep.subr.mxu1 %v419_v50  ;;  %1283 = vmatprep.subr.mxu0 %v705_v53 }
  0x2b   :  { %1230 = vmatpush3.msra.mxu1 %v419_v50  ;;  %1284 = vmatpush3.msra.mxu0 %v705_v53 }
  0x2c   :  { %1231 = vmatprep.subr.mxu1 %v418_v51  ;;  %1285 = vmatprep.subr.mxu0 %v704_v54 }
  0x2d   :  { %1232 = vmatpush3.msra.mxu1 %v418_v51  ;;  %1286 = vmatpush3.msra.mxu0 %v704_v54 }
  0x2e   :  { %1287 = vmatprep.subr.mxu0 %v703_v55 }
  0x2f   :  { %1288 = vmatpush3.msra.mxu0 %v703_v55 }
  0x30   :  { %1289 = vmatprep.subr.mxu0 %v702_v56 }
  0x31   :  { %1290 = vmatpush3.msra.mxu0 %v702_v56 }
  0x32   :  { %1291 = vmatprep.subr.mxu0 %v701_v57 }
  0x33   :  { %1292 = vmatpush3.msra.mxu0 %v701_v57 }
  0x34   :  { %1293 = vmatprep.subr.mxu0 %v700_v58 }
  0x35   :  { %1294 = vmatpush3.msra.mxu0 %v700_v58 }
  0x36   :  { %1295 = vmatprep.subr.mxu0 %v699_v59 }
  0x37   :  { %1296 = vmatpush3.msra.mxu0 %v699_v59 }
  0x38   :  { %1297 = vmatprep.subr.mxu0 %v698_v60 }
  0x39   :  { %1298 = vmatpush3.msra.mxu0 %v698_v60 }
  0x3a   :  { %1299 = vmatprep.subr.mxu0 %v697_v61 }
  0x3b   :  { %1300 = vmatpush3.msra.mxu0 %v697_v61 }
  0x3c   :  { %1301 = vmatprep.subr.mxu0 %v696_v62 }
  0x3d   :  { %1302 = vmatpush3.msra.mxu0 %v696_v62 }
  0x3e   :  { %1303 = vmatprep.subr.mxu0 %v695_v63 }
  0x3f   :  { %1304 = vmatpush3.msra.mxu0 %v695_v63 }
  0x40   :  { %1305 = vmatprep.subr.mxu0 %v694_v0 }
  0x41   :  { %1306 = vmatpush3.msra.mxu0 %v694_v0 }
  0xca   :  { %v1155_v2 = vpop.f32.mrf.mxu0 }
  0xcb   :  { %v233_v3 = vadd.f32 %v1155_v2, %v1657_v1 }
  0xcc   :  { %v227_v4 = vpop.f32.mrf.mxu0  ;;  %v1660_v5 = vpop.f32.mrf.mxu1 }
  0xcd   :  { %v228_v6 = vadd.f32 %v1657_v1, %v227_v4  ;;  %v387_v10 = vmax.f32 %v233_v3, 0.0  ;;  %v313_v63 = vadd.f32 %v1660_v5, %v1657_v1 }
  0xce   :  { %v1158_v7 = vpop.f32.mrf.mxu0  ;;  %v307_v8 = vpop.f32.mrf.mxu1 }
  0xcf   :  { %v386_v9 = vmax.f32 %v228_v6, 0.0  ;;  %v243_v11 = vadd.f32 %v1158_v7, %v1657_v1  ;;  %v308_v53 = vadd.f32 %v1657_v1, %v307_v8  ;;  %v403_v4 = vmax.f32 %v313_v63, 0.0 }
  0xd0   :  { %v237_v12 = vpop.f32.mrf.mxu0  ;;  %v1664_v13 = vpop.f32.mrf.mxu1 }
  0xd1   :  { %v238_v14 = vadd.f32 %v1657_v1, %v237_v12  ;;  %1233 = vmatprep.mubr.f32.mxu1 %v386_v9  ;;  %v389_v18 = vmax.f32 %v243_v11, 0.0  ;;  %v402_v60 = vmax.f32 %v308_v53, 0.0  ;;  %v323_v6 = vadd.f32 %v1664_v13, %v1657_v1 }
  0xd2   :  { %v1161_v15 = vpop.f32.mrf.mxu0  ;;  %1234 = vmatmul.mubr.f32.vlgmr.msra.gmra.mxu1 %v387_v10  ;;  %v317_v16 = vpop.f32.mrf.mxu1 }
  0xd3   :  { %v388_v17 = vmax.f32 %v238_v14, 0.0  ;;  %v253_v19 = vadd.f32 %v1161_v15, %v1657_v1  ;;  %v318_v61 = vadd.f32 %v1657_v1, %v317_v16  ;;  %v405_v10 = vmax.f32 %v323_v6, 0.0 }
  0xd4   :  { %v247_v20 = vpop.f32.mrf.mxu0  ;;  %v1668_v21 = vpop.f32.mrf.mxu1 }
  0xd5   :  { %v248_v22 = vadd.f32 %v1657_v1, %v247_v20  ;;  %1236 = vmatprep.mubr.f32.mxu1 %v388_v17  ;;  %v391_v25 = vmax.f32 %v253_v19, 0.0  ;;  %v404_v2 = vmax.f32 %v318_v61, 0.0  ;;  %v333_v5 = vadd.f32 %v1668_v21, %v1657_v1 }
  0xd6   :  { %v1164_v23 = vpop.f32.mrf.mxu0  ;;  %1237 = vmatmul.mubr.f32.gmra.mxu1 %v389_v18  ;;  %v327_v28 = vpop.f32.mrf.mxu1 }
  0xd7   :  { %v390_v24 = vmax.f32 %v248_v22, 0.0  ;;  %v263_v26 = vadd.f32 %v1164_v23, %v1657_v1  ;;  %v328_v3 = vadd.f32 %v1657_v1, %v327_v28  ;;  %v407_v15 = vmax.f32 %v333_v5, 0.0 }
  0xd8   :  { %v257_v27 = vpop.f32.mrf.mxu0  ;;  %v1188_v35 = vpop.f32.mrf.mxu1 }
  0xd9   :  { %v258_v29 = vadd.f32 %v1657_v1, %v257_v27  ;;  %1239 = vmatprep.mubr.f32.mxu1 %v390_v24  ;;  %v393_v32 = vmax.f32 %v263_v26, 0.0  ;;  %v406_v8 = vmax.f32 %v328_v3, 0.0  ;;  %v343_v16 = vadd.f32 %v1188_v35, %v1657_v1  ;;  %v693_v35 = vld [vmem:[%s1716_s4 + $0x10] sm:$0xff] }
  0xda   :  { %v1167_v30 = vpop.f32.mrf.mxu0  ;;  %1240 = vmatmul.mubr.f32.gmra.mxu1 %v391_v25  ;;  %v337_v42 = vpop.f32.mrf.mxu1  ;;  %1307 = vmatprep.subr.mxu0 %v693_v35 }
  0xdb   :  { %v392_v31 = vmax.f32 %v258_v29, 0.0  ;;  %v273_v33 = vadd.f32 %v1167_v30, %v1657_v1  ;;  %v338_v9 = vadd.f32 %v1657_v1, %v337_v42  ;;  %v409_v19 = vmax.f32 %v343_v16, 0.0  ;;  %1308 = vmatpush3.msra.mxu0 %v693_v35 }
  0xdc   :  { %v267_v34 = vpop.f32.mrf.mxu0  ;;  %v1191_v49 = vpop.f32.mrf.mxu1 }
  0xdd   :  { %v268_v36 = vadd.f32 %v1657_v1, %v267_v34  ;;  %1242 = vmatprep.mubr.f32.mxu1 %v392_v31  ;;  %v395_v39 = vmax.f32 %v273_v33, 0.0  ;;  %v408_v12 = vmax.f32 %v338_v9, 0.0  ;;  %v353_v20 = vadd.f32 %v1191_v49, %v1657_v1 }
  0xde   :  { %v1170_v37 = vpop.f32.mrf.mxu0  ;;  %1243 = vmatmul.mubr.f32.gmra.mxu1 %v393_v32  ;;  %v347_v57 = vpop.f32.mrf.mxu1 }
  0xdf   :  { %v394_v38 = vmax.f32 %v268_v36, 0.0  ;;  %v283_v40 = vadd.f32 %v1170_v37, %v1657_v1  ;;  %v348_v14 = vadd.f32 %v1657_v1, %v347_v57  ;;  %v411_v24 = vmax.f32 %v353_v20, 0.0  ;;  %v692_v36 = vld [vmem:[%s1716_s4 + $0x8] sm:$0xff] }
  0xe0   :  { %v277_v41 = vpop.f32.mrf.mxu0  ;;  %v1194_v0 = vpop.f32.mrf.mxu1  ;;  %1309 = vmatprep.subr.mxu0 %v692_v36 }
  0xe1   :  { %v278_v43 = vadd.f32 %v1657_v1, %v277_v41  ;;  %1245 = vmatprep.mubr.f32.mxu1 %v394_v38  ;;  %v397_v46 = vmax.f32 %v283_v40, 0.0  ;;  %v410_v17 = vmax.f32 %v348_v14, 0.0  ;;  %v363_v25 = vadd.f32 %v1194_v0, %v1657_v1  ;;  %1310 = vmatpush3.msra.mxu0 %v692_v36 }
  0xe2   :  { %v1173_v44 = vpop.f32.mrf.mxu0  ;;  %1246 = vmatmul.mubr.f32.gmra.mxu1 %v395_v39  ;;  %v357_v7 = vpop.f32.mrf.mxu1 }
  0xe3   :  { %v396_v45 = vmax.f32 %v278_v43, 0.0  ;;  %v293_v47 = vadd.f32 %v1173_v44, %v1657_v1  ;;  %v358_v18 = vadd.f32 %v1657_v1, %v357_v7  ;;  %v413_v29 = vmax.f32 %v363_v25, 0.0 }
  0xe4   :  { %v287_v48 = vpop.f32.mrf.mxu0  ;;  %v1197_v11 = vpop.f32.mrf.mxu1 }
  0xe5   :  { %v288_v50 = vadd.f32 %v1657_v1, %v287_v48  ;;  %1248 = vmatprep.mubr.f32.mxu1 %v396_v45  ;;  %v399_v54 = vmax.f32 %v293_v47, 0.0  ;;  %v412_v21 = vmax.f32 %v358_v18, 0.0  ;;  %v373_v30 = vadd.f32 %v1197_v11, %v1657_v1 }
  0xe6   :  { %v1176_v51 = vpop.f32.mrf.mxu0  ;;  %1249 = vmatmul.mubr.f32.gmra.mxu1 %v397_v46  ;;  %v367_v13 = vpop.f32.mrf.mxu1 }
  0xe7   :  { %v398_v52 = vmax.f32 %v288_v50, 0.0  ;;  %v303_v55 = vadd.f32 %v1176_v51, %v1657_v1  ;;  %v368_v23 = vadd.f32 %v1657_v1, %v367_v13  ;;  %v415_v32 = vmax.f32 %v373_v30, 0.0 }
  0xe8   :  { %v297_v56 = vpop.f32.mrf.mxu0  ;;  %v1200_v22 = vpop.f32.mrf.mxu1 }
  0xe9   :  { %v298_v58 = vadd.f32 %v1657_v1, %v297_v56  ;;  %1251 = vmatprep.mubr.f32.mxu1 %v398_v52  ;;  %v401_v62 = vmax.f32 %v303_v55, 0.0  ;;  %v414_v27 = vmax.f32 %v368_v23, 0.0  ;;  %v383_v33 = vadd.f32 %v1200_v22, %v1657_v1 }
  0xea   :  { %1252 = vmatmul.mubr.f32.gmra.mxu1 %v399_v54  ;;  %v377_v26 = vpop.f32.mrf.mxu1 }
  0xeb   :  { %v400_v59 = vmax.f32 %v298_v58, 0.0  ;;  %v378_v28 = vadd.f32 %v1657_v1, %v377_v26  ;;  %v417_v34 = vmax.f32 %v383_v33, 0.0  ;;  %v691_v1 = vld [vmem:[%s1716_s4] sm:$0xff]  ;;  %s1394_s4 = smov [#allocation2]  }
  0xec   :  { %1311 = vmatprep.subr.mxu0 %v691_v1  ;;  %s969_s22 = sshll.u32 %s1394_s4, 4  ;;  %s970_s22 = int_to_ptr.vmem [resolvable:$true] %s969_s22 }
  0xed   :  { %1254 = vmatprep.mubr.f32.mxu1 %v400_v59  ;;  %v416_v31 = vmax.f32 %v378_v28, 0.0  ;;  %1312 = vmatpush3.msra.mxu0 %v691_v1  ;;  %s1372_s23 = scalar_lea.vmem %s970_s22, 4096  ;;  %p1377_p1 = scmp.lt.s32.totalorder %s970_s22, %s970_s22 }
  0xee   :  { %1255 = vmatmul.mubr.f32.gmra.mxu1 %v401_v62  ;;  %p1373_p0 = scmp.ne.s32.totalorder %s970_s22, %s1372_s23  ;;  %p1378_p2 = scmp.lt.s32.totalorder %s1372_s23, %s1372_s23 }
  0xef   :  { %1257 = vmatprep.mubr.f32.mxu1 %v402_v60 }
  0xf0   :  { %p1379_p3 = por %p1378_p2, %p1377_p1 }
  0xf2   :  { %1258 = vmatmul.mubr.f32.gmra.mxu1 %v403_v4  ;;  %p1380_p4 = pnand %p1379_p3, %p1373_p0 }
  0xf3   :  { %1260 = vmatprep.mubr.f32.mxu1 %v404_v2 }
  0xf6   :  { %1261 = vmatmul.mubr.f32.gmra.mxu1 %v405_v10 }
  0xf7   :  { %1263 = vmatprep.mubr.f32.mxu1 %v406_v8 }
  0xfa   :  { %1264 = vmatmul.mubr.f32.gmra.mxu1 %v407_v15 }
  0xfb   :  { %1266 = vmatprep.mubr.f32.mxu1 %v408_v12 }
  0xfe   :  { %1267 = vmatmul.mubr.f32.gmra.mxu1 %v409_v19 }
  0xff   :  { %1269 = vmatprep.mubr.f32.mxu1 %v410_v17 }
 0x102   :  { %1270 = vmatmul.mubr.f32.gmra.mxu1 %v411_v24 }
 0x103   :  { %1272 = vmatprep.mubr.f32.mxu1 %v412_v21 }
 0x106   :  { %1273 = vmatmul.mubr.f32.gmra.mxu1 %v413_v29 }
 0x107   :  { %1275 = vmatprep.mubr.f32.mxu1 %v414_v27 }
 0x10a   :  { %1276 = vmatmul.mubr.f32.gmra.mxu1 %v415_v32 }
 0x10b   :  { %1278 = vmatprep.mubr.f32.mxu1 %v416_v31 }
 0x10e   :  { %1279 = vmatmul.mubr.f32.gmra.mxu1 %v417_v34 }
 0x192   :  { %v1235_v37 = vpop.f32.mrf.mxu1 }
 0x193   :  { %v506_v38 = vadd.f32 0.3, %v1235_v37 }
 0x194   :  { %v500_v39 = vpop.f32.mrf.mxu1 }
 0x195   :  { %v501_v40 = vadd.f32 0.3, %v500_v39  ;;  %v660_v43 = vmax.f32 %v506_v38, 0.0 }
 0x196   :  { %v1238_v41 = vpop.f32.mrf.mxu1 }
 0x197   :  { %v659_v42 = vmax.f32 %v501_v40, 0.0  ;;  %v516_v44 = vadd.f32 0.3, %v1238_v41 }
 0x198   :  { %v510_v45 = vpop.f32.mrf.mxu1 }
 0x199   :  { %v511_v46 = vadd.f32 0.3, %v510_v45  ;;  %1313 = vmatprep.mubr.f32.mxu0 %v659_v42  ;;  %v662_v49 = vmax.f32 %v516_v44, 0.0 }
 0x19a   :  { %v1241_v47 = vpop.f32.mrf.mxu1  ;;  %1314 = vmatmul.mubr.f32.vlgmr.msra.gmra.mxu0 %v660_v43 }
 0x19b   :  { %v661_v48 = vmax.f32 %v511_v46, 0.0  ;;  %v526_v50 = vadd.f32 0.3, %v1241_v47 }
 0x19c   :  { %v520_v51 = vpop.f32.mrf.mxu1 }
 0x19d   :  { %v521_v52 = vadd.f32 0.3, %v520_v51  ;;  %1316 = vmatprep.mubr.f32.mxu0 %v661_v48  ;;  %v664_v55 = vmax.f32 %v526_v50, 0.0 }
 0x19e   :  { %v1244_v53 = vpop.f32.mrf.mxu1  ;;  %1317 = vmatmul.mubr.f32.gmra.mxu0 %v662_v49 }
 0x19f   :  { %v663_v54 = vmax.f32 %v521_v52, 0.0  ;;  %v536_v56 = vadd.f32 0.3, %v1244_v53 }
 0x1a0   :  { %v530_v57 = vpop.f32.mrf.mxu1 }
 0x1a1   :  { %v531_v58 = vadd.f32 0.3, %v530_v57  ;;  %1319 = vmatprep.mubr.f32.mxu0 %v663_v54  ;;  %v666_v61 = vmax.f32 %v536_v56, 0.0 }
 0x1a2   :  { %v1247_v59 = vpop.f32.mrf.mxu1  ;;  %1320 = vmatmul.mubr.f32.gmra.mxu0 %v664_v55 }
 0x1a3   :  { %v665_v60 = vmax.f32 %v531_v58, 0.0  ;;  %v546_v62 = vadd.f32 0.3, %v1247_v59 }
 0x1a4   :  { %v540_v63 = vpop.f32.mrf.mxu1 }
 0x1a5   :  { %v541_v0 = vadd.f32 0.3, %v540_v63  ;;  %1322 = vmatprep.mubr.f32.mxu0 %v665_v60  ;;  %v668_v4 = vmax.f32 %v546_v62, 0.0 }
 0x1a6   :  { %v1250_v2 = vpop.f32.mrf.mxu1  ;;  %1323 = vmatmul.mubr.f32.gmra.mxu0 %v666_v61 }
 0x1a7   :  { %v667_v3 = vmax.f32 %v541_v0, 0.0  ;;  %v556_v6 = vadd.f32 0.3, %v1250_v2 }
 0x1a8   :  { %v550_v7 = vpop.f32.mrf.mxu1 }
 0x1a9   :  { %v551_v8 = vadd.f32 0.3, %v550_v7  ;;  %1325 = vmatprep.mubr.f32.mxu0 %v667_v3  ;;  %v670_v5 = vmax.f32 %v556_v6, 0.0 }
 0x1aa   :  { %v1253_v9 = vpop.f32.mrf.mxu1  ;;  %1326 = vmatmul.mubr.f32.gmra.mxu0 %v668_v4 }
 0x1ab   :  { %v669_v10 = vmax.f32 %v551_v8, 0.0  ;;  %v566_v11 = vadd.f32 0.3, %v1253_v9 }
 0x1ac   :  { %v560_v12 = vpop.f32.mrf.mxu1 }
 0x1ad   :  { %v561_v14 = vadd.f32 0.3, %v560_v12  ;;  %1328 = vmatprep.mubr.f32.mxu0 %v669_v10  ;;  %v672_v13 = vmax.f32 %v566_v11, 0.0 }
 0x1ae   :  { %v1256_v15 = vpop.f32.mrf.mxu1  ;;  %1329 = vmatmul.mubr.f32.gmra.mxu0 %v670_v5 }
 0x1af   :  { %v671_v16 = vmax.f32 %v561_v14, 0.0  ;;  %v576_v17 = vadd.f32 0.3, %v1256_v15 }
 0x1b0   :  { %v570_v18 = vpop.f32.mrf.mxu1 }
 0x1b1   :  { %v571_v19 = vadd.f32 0.3, %v570_v18  ;;  %1331 = vmatprep.mubr.f32.mxu0 %v671_v16  ;;  %v674_v21 = vmax.f32 %v576_v17, 0.0 }
 0x1b2   :  { %v1259_v20 = vpop.f32.mrf.mxu1  ;;  %1332 = vmatmul.mubr.f32.gmra.mxu0 %v672_v13 }
 0x1b3   :  { %v673_v22 = vmax.f32 %v571_v19, 0.0  ;;  %v586_v23 = vadd.f32 0.3, %v1259_v20 }
 0x1b4   :  { %v580_v24 = vpop.f32.mrf.mxu1 }
 0x1b5   :  { %v581_v25 = vadd.f32 0.3, %v580_v24  ;;  %1334 = vmatprep.mubr.f32.mxu0 %v673_v22  ;;  %v676_v28 = vmax.f32 %v586_v23, 0.0 }
 0x1b6   :  { %v1262_v26 = vpop.f32.mrf.mxu1  ;;  %1335 = vmatmul.mubr.f32.gmra.mxu0 %v674_v21 }
 0x1b7   :  { %v675_v27 = vmax.f32 %v581_v25, 0.0  ;;  %v596_v29 = vadd.f32 0.3, %v1262_v26 }
 0x1b8   :  { %v590_v30 = vpop.f32.mrf.mxu1 }
 0x1b9   :  { %v591_v31 = vadd.f32 0.3, %v590_v30  ;;  %1337 = vmatprep.mubr.f32.mxu0 %v675_v27  ;;  %v678_v34 = vmax.f32 %v596_v29, 0.0 }
 0x1ba   :  { %v1265_v32 = vpop.f32.mrf.mxu1  ;;  %1338 = vmatmul.mubr.f32.gmra.mxu0 %v676_v28 }
 0x1bb   :  { %v677_v33 = vmax.f32 %v591_v31, 0.0  ;;  %v606_v35 = vadd.f32 0.3, %v1265_v32 }
 0x1bc   :  { %v600_v36 = vpop.f32.mrf.mxu1 }
 0x1bd   :  { %v601_v1 = vadd.f32 0.3, %v600_v36  ;;  %1340 = vmatprep.mubr.f32.mxu0 %v677_v33  ;;  %v680_v39 = vmax.f32 %v606_v35, 0.0 }
 0x1be   :  { %v1268_v37 = vpop.f32.mrf.mxu1  ;;  %1341 = vmatmul.mubr.f32.gmra.mxu0 %v678_v34 }
 0x1bf   :  { %v679_v38 = vmax.f32 %v601_v1, 0.0  ;;  %v616_v40 = vadd.f32 0.3, %v1268_v37 }
 0x1c0   :  { %v610_v41 = vpop.f32.mrf.mxu1 }
 0x1c1   :  { %v611_v42 = vadd.f32 0.3, %v610_v41  ;;  %1343 = vmatprep.mubr.f32.mxu0 %v679_v38  ;;  %v682_v45 = vmax.f32 %v616_v40, 0.0 }
 0x1c2   :  { %v1271_v43 = vpop.f32.mrf.mxu1  ;;  %1344 = vmatmul.mubr.f32.gmra.mxu0 %v680_v39 }
 0x1c3   :  { %v681_v44 = vmax.f32 %v611_v42, 0.0  ;;  %v626_v46 = vadd.f32 0.3, %v1271_v43 }
 0x1c4   :  { %v620_v47 = vpop.f32.mrf.mxu1 }
 0x1c5   :  { %v621_v48 = vadd.f32 0.3, %v620_v47  ;;  %1346 = vmatprep.mubr.f32.mxu0 %v681_v44  ;;  %v684_v51 = vmax.f32 %v626_v46, 0.0 }
 0x1c6   :  { %v1274_v49 = vpop.f32.mrf.mxu1  ;;  %1347 = vmatmul.mubr.f32.gmra.mxu0 %v682_v45 }
 0x1c7   :  { %v683_v50 = vmax.f32 %v621_v48, 0.0  ;;  %v636_v52 = vadd.f32 0.3, %v1274_v49 }
 0x1c8   :  { %v630_v53 = vpop.f32.mrf.mxu1 }
 0x1c9   :  { %v631_v54 = vadd.f32 0.3, %v630_v53  ;;  %1349 = vmatprep.mubr.f32.mxu0 %v683_v50  ;;  %v686_v57 = vmax.f32 %v636_v52, 0.0 }
 0x1ca   :  { %v1277_v55 = vpop.f32.mrf.mxu1  ;;  %1350 = vmatmul.mubr.f32.gmra.mxu0 %v684_v51 }
 0x1cb   :  { %v685_v56 = vmax.f32 %v631_v54, 0.0  ;;  %v646_v58 = vadd.f32 0.3, %v1277_v55 }
 0x1cc   :  { %v640_v59 = vpop.f32.mrf.mxu1 }
 0x1cd   :  { %v641_v60 = vadd.f32 0.3, %v640_v59  ;;  %1352 = vmatprep.mubr.f32.mxu0 %v685_v56  ;;  %v688_v63 = vmax.f32 %v646_v58, 0.0 }
 0x1ce   :  { %v1280_v61 = vpop.f32.mrf.mxu1  ;;  %1353 = vmatmul.mubr.f32.gmra.mxu0 %v686_v57 }
 0x1cf   :  { %v687_v62 = vmax.f32 %v641_v60, 0.0  ;;  %v656_v0 = vadd.f32 0.3, %v1280_v61 }
 0x1d0   :  { %v650_v2 = vpop.f32.mrf.mxu1 }
 0x1d1   :  { %v651_v3 = vadd.f32 0.3, %v650_v2  ;;  %1355 = vmatprep.mubr.f32.mxu0 %v687_v62  ;;  %v690_v6 = vmax.f32 %v656_v0, 0.0 }
 0x1d2   :  { %1356 = vmatmul.mubr.f32.gmra.mxu0 %v688_v63 }
 0x1d3   :  { %v689_v4 = vmax.f32 %v651_v3, 0.0 }
 0x1d5   :  { %1358 = vmatprep.mubr.f32.mxu0 %v689_v4 }
 0x1d6   :  { %1359 = vmatmul.mubr.f32.gmra.mxu0 %v690_v6 }
 0x25a   :  { %v1315_v7 = vpop.f32.mrf.mxu0 }
 0x25b   :  { %v779_v8 = vadd.f32 0.05, %v1315_v7 }
 0x25c   :  { %v773_v9 = vpop.f32.mrf.mxu0 }
 0x25d   :  { %933 = vst [vmem:[#allocation2 + $0x8] sm:$0xff] %v779_v8  ;;  %v774_v10 = vadd.f32 0.05, %v773_v9 }
 0x25e   :  { %v1318_v5 = vpop.f32.mrf.mxu0 }
 0x25f   :  { %932 = vst [vmem:[#allocation2] sm:$0xff] %v774_v10  ;;  %v789_v11 = vadd.f32 0.05, %v1318_v5 }
 0x260   :  { %v783_v12 = vpop.f32.mrf.mxu0 }
 0x261   :  { %935 = vst [vmem:[#allocation2 + $0x18] sm:$0xff] %v789_v11  ;;  %v784_v14 = vadd.f32 0.05, %v783_v12 }
 0x262   :  { %v1321_v15 = vpop.f32.mrf.mxu0 }
 0x263   :  { %934 = vst [vmem:[#allocation2 + $0x10] sm:$0xff] %v784_v14  ;;  %v799_v16 = vadd.f32 0.05, %v1321_v15 }
 0x264   :  { %v793_v13 = vpop.f32.mrf.mxu0 }
 0x265   :  { %937 = vst [vmem:[#allocation2 + $0x28] sm:$0xff] %v799_v16  ;;  %v794_v17 = vadd.f32 0.05, %v793_v13 }
 0x266   :  { %v1324_v18 = vpop.f32.mrf.mxu0 }
 0x267   :  { %936 = vst [vmem:[#allocation2 + $0x20] sm:$0xff] %v794_v17  ;;  %v809_v19 = vadd.f32 0.05, %v1324_v18 }
 0x268   :  { %v803_v20 = vpop.f32.mrf.mxu0 }
 0x269   :  { %939 = vst [vmem:[#allocation2 + $0x38] sm:$0xff] %v809_v19  ;;  %v804_v22 = vadd.f32 0.05, %v803_v20 }
 0x26a   :  { %v1327_v21 = vpop.f32.mrf.mxu0 }
 0x26b   :  { %938 = vst [vmem:[#allocation2 + $0x30] sm:$0xff] %v804_v22  ;;  %v819_v23 = vadd.f32 0.05, %v1327_v21 }
 0x26c   :  { %v813_v24 = vpop.f32.mrf.mxu0 }
 0x26d   :  { %941 = vst [vmem:[#allocation2 + $0x48] sm:$0xff] %v819_v23  ;;  %v814_v25 = vadd.f32 0.05, %v813_v24 }
 0x26e   :  { %v1330_v26 = vpop.f32.mrf.mxu0 }
 0x26f   :  { %940 = vst [vmem:[#allocation2 + $0x40] sm:$0xff] %v814_v25  ;;  %v829_v27 = vadd.f32 0.05, %v1330_v26 }
 0x270   :  { %v823_v28 = vpop.f32.mrf.mxu0 }
 0x271   :  { %943 = vst [vmem:[#allocation2 + $0x58] sm:$0xff] %v829_v27  ;;  %v824_v29 = vadd.f32 0.05, %v823_v28 }
 0x272   :  { %v1333_v30 = vpop.f32.mrf.mxu0 }
 0x273   :  { %942 = vst [vmem:[#allocation2 + $0x50] sm:$0xff] %v824_v29  ;;  %v839_v31 = vadd.f32 0.05, %v1333_v30 }
 0x274   :  { %v833_v32 = vpop.f32.mrf.mxu0 }
 0x275   :  { %945 = vst [vmem:[#allocation2 + $0x68] sm:$0xff] %v839_v31  ;;  %v834_v33 = vadd.f32 0.05, %v833_v32 }
 0x276   :  { %v1336_v34 = vpop.f32.mrf.mxu0 }
 0x277   :  { %944 = vst [vmem:[#allocation2 + $0x60] sm:$0xff] %v834_v33  ;;  %v849_v35 = vadd.f32 0.05, %v1336_v34 }
 0x278   :  { %v843_v36 = vpop.f32.mrf.mxu0 }
 0x279   :  { %947 = vst [vmem:[#allocation2 + $0x78] sm:$0xff] %v849_v35  ;;  %v844_v1 = vadd.f32 0.05, %v843_v36 }
 0x27a   :  { %v1339_v37 = vpop.f32.mrf.mxu0 }
 0x27b   :  { %946 = vst [vmem:[#allocation2 + $0x70] sm:$0xff] %v844_v1  ;;  %v859_v38 = vadd.f32 0.05, %v1339_v37 }
 0x27c   :  { %v853_v39 = vpop.f32.mrf.mxu0 }
 0x27d   :  { %949 = vst [vmem:[#allocation2 + $0x88] sm:$0xff] %v859_v38  ;;  %v854_v40 = vadd.f32 0.05, %v853_v39 }
 0x27e   :  { %v1342_v41 = vpop.f32.mrf.mxu0 }
 0x27f   :  { %948 = vst [vmem:[#allocation2 + $0x80] sm:$0xff] %v854_v40  ;;  %v869_v42 = vadd.f32 0.05, %v1342_v41 }
 0x280   :  { %v863_v43 = vpop.f32.mrf.mxu0 }
 0x281   :  { %951 = vst [vmem:[#allocation2 + $0x98] sm:$0xff] %v869_v42  ;;  %v864_v44 = vadd.f32 0.05, %v863_v43 }
 0x282   :  { %v1345_v45 = vpop.f32.mrf.mxu0 }
 0x283   :  { %950 = vst [vmem:[#allocation2 + $0x90] sm:$0xff] %v864_v44  ;;  %v879_v46 = vadd.f32 0.05, %v1345_v45 }
 0x284   :  { %v873_v47 = vpop.f32.mrf.mxu0 }
 0x285   :  { %953 = vst [vmem:[#allocation2 + $0xa8] sm:$0xff] %v879_v46  ;;  %v874_v48 = vadd.f32 0.05, %v873_v47 }
 0x286   :  { %v1348_v49 = vpop.f32.mrf.mxu0 }
 0x287   :  { %952 = vst [vmem:[#allocation2 + $0xa0] sm:$0xff] %v874_v48  ;;  %v889_v50 = vadd.f32 0.05, %v1348_v49 }
 0x288   :  { %v883_v51 = vpop.f32.mrf.mxu0 }
 0x289   :  { %955 = vst [vmem:[#allocation2 + $0xb8] sm:$0xff] %v889_v50  ;;  %v884_v52 = vadd.f32 0.05, %v883_v51 }
 0x28a   :  { %v1351_v53 = vpop.f32.mrf.mxu0 }
 0x28b   :  { %954 = vst [vmem:[#allocation2 + $0xb0] sm:$0xff] %v884_v52  ;;  %v899_v54 = vadd.f32 0.05, %v1351_v53 }
 0x28c   :  { %v893_v55 = vpop.f32.mrf.mxu0 }
 0x28d   :  { %957 = vst [vmem:[#allocation2 + $0xc8] sm:$0xff] %v899_v54  ;;  %v894_v56 = vadd.f32 0.05, %v893_v55 }
 0x28e   :  { %v1354_v57 = vpop.f32.mrf.mxu0 }
 0x28f   :  { %956 = vst [vmem:[#allocation2 + $0xc0] sm:$0xff] %v894_v56  ;;  %v909_v58 = vadd.f32 0.05, %v1354_v57 }
 0x290   :  { %v903_v59 = vpop.f32.mrf.mxu0 }
 0x291   :  { %959 = vst [vmem:[#allocation2 + $0xd8] sm:$0xff] %v909_v58  ;;  %v904_v60 = vadd.f32 0.05, %v903_v59 }
 0x292   :  { %v1357_v61 = vpop.f32.mrf.mxu0 }
 0x293   :  { %958 = vst [vmem:[#allocation2 + $0xd0] sm:$0xff] %v904_v60  ;;  %v919_v62 = vadd.f32 0.05, %v1357_v61 }
 0x294   :  { %v913_v63 = vpop.f32.mrf.mxu0 }
 0x295   :  { %961 = vst [vmem:[#allocation2 + $0xe8] sm:$0xff] %v919_v62  ;;  %v914_v0 = vadd.f32 0.05, %v913_v63 }
 0x296   :  { %v1360_v2 = vpop.f32.mrf.mxu0 }
 0x297   :  { %960 = vst [vmem:[#allocation2 + $0xe0] sm:$0xff] %v914_v0  ;;  %v929_v3 = vadd.f32 0.05, %v1360_v2 }
 0x298   :  { %v923_v4 = vpop.f32.mrf.mxu0 }
 0x299   :  { %963 = vst [vmem:[#allocation2 + $0xf8] sm:$0xff] %v929_v3  ;;  %v924_v6 = vadd.f32 0.05, %v923_v4 }
 0x29b   :  { %962 = vst [vmem:[#allocation2 + $0xf0] sm:$0xff] %v924_v6 }
 0x29c   :  { %1383 = shalt.err (!%p1380_p4)
}
 0x29d   :  { %s1395_s3 = smov 128   ;;  %s1396_s24 = smov 8  }
 0x29e   :  { %975 = dma.vmem_to_hbm [thread:$0]  %s970_s22, 4096, %s1717_s5, [#allocation3], %s1395_s3, %s1395_s3, %s1396_s24  }
 0x29f   :  { %1392 = dma.done.wait [#allocation3], 4096  }
 0x2a0   :  { %1393 = vsyncadd [#allocation3], 4294963200 }
 0x2a1   :  { %979 = vsyncpa [#allocation3], 1 }

</bundles_post_ra>
